<compile_context>
chip_gen: v6e
topology: v6e:2x2x1
jax: 0.10.0
libtpu: 0.0.40
codegen_flags: <defaults>
</compile_context>

<pallas_src>
import jax
import jax.numpy as jnp
from jax import lax
from jax.experimental import pallas as pl
from jax.experimental.pallas import tpu as pltpu


def _round_up(x, m):
    return ((x + m - 1) // m) * m


_VMEM_LIMIT = 32 * 1024 * 1024  # > v5e's 16 MiB default, < v7x's 64 MiB physical


# ---------------------------------------------------------------------------
# Path 1: classifier-head GEMV (Cout tiny, e.g. Cout == 1).
# ---------------------------------------------------------------------------
def _gemv_kernel(wt_ref, x_ref, b_ref, o_ref):
    # wt_ref: (Cout, Cin)  -- tiny, resident across the whole grid
    # x_ref : (tb,  Cin)   -- native-layout activation tile (no wrapper x.T)
    # b_ref : (Cout, 1)
    # o_ref : (Cout, tb)   -- lane-dense: batch on lanes, full-lane stores
    prod = lax.dot_general(
        wt_ref[...], x_ref[...],
        dimension_numbers=(((1,), (1,)), ((), ())),   # contract Cin with Cin
        preferred_element_type=jnp.float32)
    o_ref[...] = (prod + b_ref[...]).astype(o_ref.dtype)


def _pick_tb_gemv(B, Cin, bytes_per_elem):
    """Batch tile for the GEMV path.

    Big enough to amortize the ~0.35us/step cost, but (a) keep >=2 blocks
    along the (parallel) batch axis when B is large so both v7x TensorCores
    get work, and (b) keep the multi-buffered X footprint well under VMEM.
    """
    if B <= 512:
        return _round_up(B, 8)          # one full-extent block
    budget = 24 * 1024 * 1024
    for tb in (1024, 512, 256, 128):
        if tb <= B // 2 and 3 * tb * Cin * bytes_per_elem <= budget:
            return tb
    return 128


def _linear_gemv_pallas(x, w, b, *, compute_dtype=None):
    B, Cin = x.shape
    Cout = w.shape[1]

    wt = w.T                                            # (Cout, Cin) -- tiny
    if compute_dtype is not None:
        wt = wt.astype(compute_dtype)
        x = x.astype(compute_dtype)

    bytes_per_elem = jnp.dtype(x.dtype).itemsize
    tb = _pick_tb_gemv(B, Cin, bytes_per_elem)
    B_p = _round_up(B, tb)
    if B_p != B:
        # Only a batch-tail pad; X is never transposed and never K-padded
        # (the block spans the full native Cin).
        x = jnp.pad(x, ((0, B_p - B), (0, 0)))

    b2 = b.astype(jnp.float32).reshape(Cout, 1)

    n_blocks = B_p // tb
    x_spec_kwargs = {}
    if n_blocks >= 3:
        # Extra buffering keeps DMAs ahead of the consumer on v7x's faster HBM.
        x_spec_kwargs = dict(pipeline_mode=pl.Buffered(3))

    out_t = pl.pallas_call(
        _gemv_kernel,
        out_shape=jax.ShapeDtypeStruct((Cout, B_p), jnp.float32),
        grid=(n_blocks,),
        in_specs=[
            pl.BlockSpec((Cout, Cin), lambda j: (0, 0)),            # W^T resident
            pl.BlockSpec((tb, Cin), lambda j: (j, 0), **x_spec_kwargs),
            pl.BlockSpec((Cout, 1), lambda j: (0, 0)),              # bias
        ],
        out_specs=pl.BlockSpec((Cout, tb), lambda j: (0, j)),
        compiler_params=pltpu.CompilerParams(
            dimension_semantics=("parallel",),
            vmem_limit_bytes=_VMEM_LIMIT,
        ),
    )(wt, x, b2)

    # Back to torch layout (B, Cout). Trivial for a sliver-sized Cout.
    return out_t[:, :B].T


# ---------------------------------------------------------------------------
# Path 2: general tiled matmul (large Cout) -- (B, Cout) produced directly.
# ---------------------------------------------------------------------------
def _tiled_kernel(x_ref, w_ref, b_ref, o_ref):
    k = pl.program_id(2)

    @pl.when(k == 0)
    def _init():
        # Output block is resident across the K axis (its index_map ignores k),
        # so accumulate straight into it: init with the bias, no scratch,
        # no epilogue copy.
        o_ref[...] = jnp.broadcast_to(b_ref[...], o_ref.shape)

    o_ref[...] += jnp.dot(x_ref[...], w_ref[...],
                          preferred_element_type=jnp.float32)


def _pick_tk(Cin, max_tk=1024):
    """Reduction tile that minimizes K zero-padding."""
    cin128 = _round_up(Cin, 128)
    if cin128 <= max_tk:
        return cin128
    for cand in range(max_tk, 127, -128):
        if cin128 % cand == 0:
            return cand
    return 128


def _linear_tiled_pallas(x, w, b, *, compute_dtype=None):
    B, Cin = x.shape
    Cout = w.shape[1]

    if compute_dtype is not None:
        x = x.astype(compute_dtype)
        w = w.astype(compute_dtype)

    tco = min(256, _round_up(Cout, 128))
    tb = min(512, _round_up(B, 8))
    tk = _pick_tk(Cin)

    B_p = _round_up(B, tb)
    Cout_p = _round_up(Cout, tco)
    Cin_p = _round_up(Cin, tk)

    if (B_p, Cin_p) != (B, Cin):
        x = jnp.pad(x, ((0, B_p - B), (0, Cin_p - Cin)))
    if (Cin_p, Cout_p) != (Cin, Cout):
        w = jnp.pad(w, ((0, Cin_p - Cin), (0, Cout_p - Cout)))
    b2 = jnp.pad(b.astype(jnp.float32), (0, Cout_p - Cout)).reshape(1, Cout_p)

    grid = (B_p // tb, Cout_p // tco, Cin_p // tk)

    out = pl.pallas_call(
        _tiled_kernel,
        out_shape=jax.ShapeDtypeStruct((B_p, Cout_p), jnp.float32),
        grid=grid,
        in_specs=[
            pl.BlockSpec((tb, tk), lambda i, j, k: (i, k)),    # X tile
            pl.BlockSpec((tk, tco), lambda i, j, k: (k, j)),   # W tile
            pl.BlockSpec((1, tco), lambda i, j, k: (0, j)),    # bias tile
        ],
        out_specs=pl.BlockSpec((tb, tco), lambda i, j, k: (i, j)),
        compiler_params=pltpu.CompilerParams(
            dimension_semantics=("parallel", "parallel", "arbitrary"),
            vmem_limit_bytes=_VMEM_LIMIT,
        ),
    )(x, w, b2)

    return out[:B, :Cout]


# ---------------------------------------------------------------------------
# Dispatch + module forward.
# ---------------------------------------------------------------------------
def linear_forward(x, w, b, *, force_pallas=False, compute_dtype=None):
    """x: (B, Cin), w: (Cin, Cout), b: (Cout,) -> (B, Cout) float32."""
    B, Cin = x.shape
    Cout = w.shape[1]
    if not force_pallas and B * Cin * Cout < 128 * 512:
        # Tiny heads are pure launch/DMA overhead for a custom kernel; XLA
        # fuses them for free.
        return (x @ w + b[None, :]).astype(jnp.float32)
    if Cout <= 16 and 3 * 128 * Cin * 4 <= 24 * 1024 * 1024:
        return _linear_gemv_pallas(x, w, b, compute_dtype=compute_dtype)
    return _linear_tiled_pallas(x, w, b, compute_dtype=compute_dtype)


def classifier_forward(x, w, b, *, force_pallas=False):
    """Reproduces Classifier.forward: Linear then squeeze(-1)."""
    y = linear_forward(x, w, b, force_pallas=force_pallas)
    # torch's squeeze(-1) only drops the last dim when it has size 1.
    if y.shape[-1] == 1:
        y = jnp.squeeze(y, axis=-1)
    return y


def init_linear_params(key, in_channel, out_channel):
    """nn.Linear default init: U(-1/sqrt(in), 1/sqrt(in))."""
    kw, kb = jax.random.split(key)
    bound = 1.0 / jnp.sqrt(jnp.float32(in_channel))
    # Stored as (in, out) == transpose of torch's (out, in) weight.
    w = jax.random.uniform(kw, (in_channel, out_channel), jnp.float32,
                           minval=-bound, maxval=bound)
    b = jax.random.uniform(kb, (out_channel,), jnp.float32,
                           minval=-bound, maxval=bound)
    return w, b


# TODO(synk): training pieces (SGD optimizer, MSELoss, train_model, plotting)
# are module state, not part of the forward pass, and are not implemented.

if __name__ == "__main__":
    key = jax.random.PRNGKey(0)
    k_x, k_p, k_x2, k_p2, k_x3, k_p3 = jax.random.split(key, 6)

    # 1) The literal module shape (binary-classification head): GEMV path,
    #    single block, no padding, no wrapper-side copies of X.
    batch, in_channel, out_channel = 8, 32, 1
    x = jax.random.normal(k_x, (batch, in_channel), dtype=jnp.float32)
    w, b = init_linear_params(k_p, in_channel, out_channel)
    y = classifier_forward(x, w, b, force_pallas=True)
    y = jax.block_until_ready(y)
    y_ref = jnp.squeeze(x @ w + b[None, :], axis=-1)
    assert y.shape == (batch,), y.shape
    assert jnp.allclose(y, y_ref, atol=1e-5, rtol=1e-5)

    # 2) Larger head: GEMV path with 2 batch blocks (both v7x TCs get work),
    #    native-layout X, full-Cin block -> zero K padding, no X copies.
    B2, Cin2, Cout2 = 1024, 640, 1
    x2 = jax.random.normal(k_x2, (B2, Cin2), dtype=jnp.float32)
    w2, b2 = init_linear_params(k_p2, Cin2, Cout2)
    y2 = classifier_forward(x2, w2, b2, force_pallas=True)
    y2 = jax.block_until_ready(y2)
    y2_ref = jnp.squeeze(x2 @ w2 + b2[None, :], axis=-1)
    assert y2.shape == (B2,), y2.shape
    assert jnp.allclose(y2, y2_ref, atol=1e-4, rtol=1e-4)

    # 3) Wide-output shape: general tiled path with a 2-step K reduction that
    #    accumulates directly into the resident (B, Cout) output block.
    B3, Cin3, Cout3 = 128, 2048, 256
    x3 = jax.random.normal(k_x3, (B3, Cin3), dtype=jnp.float32)
    w3, b3 = init_linear_params(k_p3, Cin3, Cout3)
    y3 = linear_forward(x3, w3, b3, force_pallas=True)
    y3 = jax.block_until_ready(y3)
    y3_ref = x3 @ w3 + b3[None, :]
    assert y3.shape == (B3, Cout3), y3.shape
    assert jnp.allclose(y3, y3_ref, atol=2e-3, rtol=2e-3)

    print("KERNEL_OK")
</pallas_src>

<mosaic_0001>
module attributes {stable_mosaic.version = 11 : i64} {
  func.func @_gemv_kernel(%arg0: i32, %arg1: memref<1x32xf32, #tpu.memory_space<vmem>>, %arg2: memref<8x32xf32, #tpu.memory_space<vmem>>, %arg3: memref<1x1xf32, #tpu.memory_space<vmem>>, %arg4: memref<1x8xf32, #tpu.memory_space<vmem>>) attributes {dimension_semantics = [#tpu.dimension_semantics<parallel>], iteration_bounds = array<i64: 1>, scalar_prefetch = 0 : i64, scratch_operands = 0 : i64, tpu.core_type = #tpu.core_type<tc>, window_params = [{pipeline_mode = #tpu.pipeline_mode<synchronous>, transform_indices = @transform_0, window_bounds = array<i64: 1, 32>}, {transform_indices = @transform_1, window_bounds = array<i64: 8, 32>}, {pipeline_mode = #tpu.pipeline_mode<synchronous>, transform_indices = @transform_2, window_bounds = array<i64: 1, 1>}, {transform_indices = @transform_3, window_bounds = array<i64: 1, 8>}]} {
    %c0 = arith.constant 0 : index
    %c0_0 = arith.constant 0 : index
    %0 = vector.load %arg1[%c0, %c0_0] : memref<1x32xf32, #tpu.memory_space<vmem>>, vector<1x32xf32>
    %c0_1 = arith.constant 0 : index
    %c0_2 = arith.constant 0 : index
    %1 = vector.load %arg2[%c0_1, %c0_2] : memref<8x32xf32, #tpu.memory_space<vmem>>, vector<8x32xf32>
    %cst = arith.constant dense<0.000000e+00> : vector<1x8xf32>
    %2 = tpu.matmul %0, %1, %cst {dimension_numbers = #tpu.dot_dimension_numbers<[1], [1], [0], [0], [0, 0, 1, 0], [], []>} : vector<1x32xf32>, vector<8x32xf32>, vector<1x8xf32> -> vector<1x8xf32>
    %c0_3 = arith.constant 0 : index
    %c0_4 = arith.constant 0 : index
    %3 = vector.load %arg3[%c0_3, %c0_4] : memref<1x1xf32, #tpu.memory_space<vmem>>, vector<1x1xf32>
    %4 = vector.broadcast %3 : vector<1x1xf32> to vector<1x8xf32>
    %5 = arith.addf %2, %4 : vector<1x8xf32>
    %c0_5 = arith.constant 0 : index
    %c0_6 = arith.constant 0 : index
    %6 = vector.load %arg4[%c0_5, %c0_6] : memref<1x8xf32, #tpu.memory_space<vmem>>, vector<1x8xf32>
    tpu.vector_store %arg4[%c0_5, %c0_6], %5 {strides = array<i32>} : memref<1x8xf32, #tpu.memory_space<vmem>>, vector<1x8xf32>,
    return
  }
  func.func @transform_0(%arg0: i32) -> (i32, i32) {
    %c0_i32 = arith.constant 0 : i32
    %c0_i32_0 = arith.constant 0 : i32
    %c0_i32_1 = arith.constant 0 : i32
    return %c0_i32, %c0_i32_0 : i32, i32
  }
  func.func @transform_1(%arg0: i32) -> (i32, i32) {
    %c0_i32 = arith.constant 0 : i32
    %c0_i32_0 = arith.constant 0 : i32
    return %arg0, %c0_i32 : i32, i32
  }
  func.func @transform_2(%arg0: i32) -> (i32, i32) {
    %c0_i32 = arith.constant 0 : i32
    %c0_i32_0 = arith.constant 0 : i32
    %c0_i32_1 = arith.constant 0 : i32
    return %c0_i32, %c0_i32_0 : i32, i32
  }
  func.func @transform_3(%arg0: i32) -> (i32, i32) {
    %c0_i32 = arith.constant 0 : i32
    %c0_i32_0 = arith.constant 0 : i32
    return %c0_i32, %arg0 : i32, i32
  }
}

</mosaic_0001>

<bundles_post_ra>
// kernel: tpu_custom_call.1
= control target key start
LH: loop header
LB: loop body
LE: loop exit
PB: predicated region body
PF: predicated region fallthrough
CT: control target
= control target key end

     0   :  { %s231_s0 = inlined_call_operand.vmem [shape: f32[1,32], index: 0, kind: input, shape index: {}]   ;;  %s232_s1 = inlined_call_operand.hbm [shape: f32[8,32], index: 1, kind: input, shape index: {}]   ;;  %s233_s2 = inlined_call_operand.<no memory space> [shape: f32[1,1], index: 2, kind: input, shape index: {}]   ;;  %s234_s3 = inlined_call_operand.hbm [shape: f32[1,8], index: 3, kind: output, shape index: {}]  }
   0x1   :  { %v8_v0 = vstv %s233_s2 }
   0x2   :  { %9 = vst [vmem:[#allocation2] sm:$0x1] %v8_v0 }
   0x3   :  { %10 = vsyncpa [#allocation4], 0 }
   0x4   :  { %11 = vsyncpa [#allocation5], 0  ;;  %s194_s14 = smov [#allocation3]  }
   0x5   :  { %s20_s15 = sshll.u32 %s194_s14, 4  ;;  %s21_s15 = int_to_ptr.vmem [resolvable:$true] %s20_s15 }
   0x6   :  { %s158_s16 = scalar_lea.vmem %s21_s15, 128  ;;  %p163_p1 = scmp.lt.s32.totalorder %s21_s15, %s21_s15 }
   0x7   :  { %p159_p0 = scmp.ne.s32.totalorder %s21_s15, %s158_s16  ;;  %p164_p2 = scmp.lt.s32.totalorder %s158_s16, %s158_s16 }
   0x9   :  { %p165_p3 = por %p164_p2, %p163_p1 }
   0xb   :  { %p166_p4 = pnand %p165_p3, %p159_p0 }
   0xd   :  { %169 = shalt.err (!%p166_p4)
}
   0xe   :  { %23 = dma.hbm_to_vmem [thread:$0]  %s232_s1, 128, %s21_s15, [#allocation4]  }
   0xf   :  { %190 = dma.done.wait [#allocation4], 128  }
  0x10   :  { %191 = vsyncadd [#allocation4], 4294967168  ;;  %v195_v1 = vmov 0.0   ;;  %vm196_vm0 = vmmov 0   ;;  %v197_v2 = vmov 0   ;;  %vm41_vm1 = vcmask 261120  }
  0x11   :  { %139 = vmatprep.subr.mxu0 %v195_v1  ;;  %141 = vmatprep.mubr.msk.f32.mxu0 %vm196_vm0, %v195_v1  ;;  %v30_v3 = vld [vmem:[#allocation3] sm:$0xff]  ;;  %v31_v4 = vld [vmem:[#allocation2] sm:$0x1]  ;;  %v37_v6 = vlaneseq  ;;  %s198_s1 = smov [#allocation6]   ;;  %vm118_vm2 = vcmask 57344  }
  0x12   :  { %149 = vset.pattern.permute.xlu0 %v197_v2  ;;  %140 = vmatpush3.xpose.msk.msra.mxu0 %vm41_vm1, %v30_v3  ;;  %v29_v5 = vld [vmem:[%s231_s0] sm:$0x1]  ;;  %s126_s20 = sshll.u32 %s198_s1, 4  ;;  %s127_s20 = int_to_ptr.vmem [resolvable:$true] %s126_s20 }
  0x13   :  { %34 = vperm.xlu0 %149, %v31_v4   ;;  %v38_v7 = vshrl.u32 %v37_v6, 7  ;;  %s170_s21 = scalar_lea.vmem %s127_s20, 16  ;;  %s174_s22 = scalar_lea.vmem %s127_s20, 32 }
  0x14   :  { %p171_p5 = scmp.ne.s32.totalorder %s127_s20, %s170_s21  ;;  %p175_p6 = scmp.lt.s32.totalorder %s127_s20, %s127_s20 }
  0x15   :  { %142 = vmatmul.mubr.msk.f32.vlgmr.msra.gmra.mxu0 %vm41_vm1, %v29_v5  ;;  %v39_v8 = vsub.s32 0, %v38_v7  ;;  %p176_p7 = scmp.lt.s32.totalorder %s174_s22, %s170_s21 }
  0x17   :  { %p177_p8 = por %p176_p7, %p175_p6 }
  0x19   :  { %p178_p9 = pnand %p177_p8, %p171_p5 }
  0x8e   :  { %v35_v9 = vpop.permute.xlu0 %34 }
  0x8f   :  { %v40_v10 = vrot.slane %v35_v9, %v39_v8 }
  0xd5   :  { %v114_v11 = vpop.f32.mrf.mxu0 }
  0xd6   :  { %v115_v12 = vadd.f32 %v114_v11, %v40_v10 }
  0xd7   :  { %v143_v13 = vpop.f32.mrf.mxu0 }
  0xd8   :  { %119 = vst.msk [vmem:[#allocation6] sm:$0x1] %vm118_vm2, %v115_v12 }
  0xd9   :  { %181 = shalt.err (!%p178_p9)
}
  0xda   :  { %129 = dma.vmem_to_hbm [thread:$0]  %s127_s20, 16, %s234_s3, [#allocation5]  }
  0xdb   :  { %192 = dma.done.wait [#allocation5], 16  }
  0xdc   :  { %193 = vsyncadd [#allocation5], 4294967280 }
  0xdd   :  { %133 = vsyncpa [#allocation4], 1 }
  0xde   :  { %134 = vsyncpa [#allocation5], 1 }

</bundles_post_ra>
